<compile_context>
chip_gen: v6e
topology: v6e:2x2x1
jax: 0.10.0
libtpu: 0.0.40
codegen_flags: <defaults>
</compile_context>

<pallas_src>
import jax
import jax.numpy as jnp
from jax.experimental import pallas as pl
from jax.experimental.pallas import tpu as pltpu

HIDDEN = 64        # logical hidden width (matches nn.Linear(in, 64))
HIDDEN_PAD = 128   # hidden lanes padded to a full 128-lane vreg (weights are tiny)


def _round_up(x, m):
    return ((x + m - 1) // m) * m


def _pad2(a, rows, cols, dtype):
    """Zero-pad a 2-D array up to (rows, cols) and cast."""
    return jnp.pad(a, ((0, rows - a.shape[0]), (0, cols - a.shape[1]))).astype(dtype)


def mlp_kernel(x_ref, w1_ref, b1_ref, w2_ref, b2_ref, w3_ref, b3_ref, o_ref):
    # x stays f32 in HBM; cast to bf16 in-register (hidden under the tile DMA).
    x = x_ref[...].astype(jnp.bfloat16)
    # dense1 + relu   (dropout1 = identity in eval mode)
    h1 = jnp.dot(x, w1_ref[...], preferred_element_type=jnp.float32)
    h1 = jnp.maximum(h1 + b1_ref[...], 0.0)
    # dense2 + relu   (dropout2 = identity in eval mode)
    h2 = jnp.dot(h1.astype(jnp.bfloat16), w2_ref[...],
                 preferred_element_type=jnp.float32)
    h2 = jnp.maximum(h2 + b2_ref[...], 0.0)
    # dense3 -> narrow logical output width (no lane padding on the store)
    out = jnp.dot(h2.astype(jnp.bfloat16), w3_ref[...],
                  preferred_element_type=jnp.float32)
    o_ref[...] = (out + b3_ref[...]).astype(o_ref.dtype)


def _pick_tm(batch, in_feature, *, max_rows=4096):
    """Largest batch tile that (a) keeps the double-buffered f32 x tile well
    under the scoped VMEM limit and (b) yields >=4 grid steps for large
    batches (megacore sharding on v7x + pipelining)."""
    # ~8 MiB per x buffer (f32) -> ~16 MiB double-buffered, < 32 MiB limit.
    vmem_cap = max(8, ((8 << 20) // (4 * max(in_feature, 1))) // 8 * 8)
    if batch <= 64:
        tm = _round_up(batch, 8)          # exact fit / no ragged edge at tiny B
    else:
        tm = _round_up(pl.cdiv(batch, 4), 16)
    return max(8, min(tm, max_rows, vmem_cap))


def custom_classifier_forward(x, params):
    """x: [B, in_feature] float32 -> [B, out_feature] float32."""
    w1, b1, w2, b2, w3, b3 = params
    B, F = x.shape
    out_feature = w3.shape[1]

    # --- pad / cast parameters (tiny one-time op; VMEM-resident across grid) ---
    w1p = _pad2(w1, F, HIDDEN_PAD, jnp.bfloat16)
    b1p = _pad2(b1, 1, HIDDEN_PAD, jnp.float32)
    w2p = _pad2(w2, HIDDEN_PAD, HIDDEN_PAD, jnp.bfloat16)
    b2p = _pad2(b2, 1, HIDDEN_PAD, jnp.float32)
    w3p = _pad2(w3, HIDDEN_PAD, out_feature, jnp.bfloat16)
    b3p = b3.astype(jnp.float32)

    tm = _pick_tm(B, F)
    grid = (pl.cdiv(B, tm),)

    def const_spec(a):
        return pl.BlockSpec(a.shape, lambda i: (0,) * a.ndim)

    flops = 2 * B * (F * HIDDEN_PAD + HIDDEN_PAD * HIDDEN_PAD
                     + HIDDEN_PAD * out_feature)
    bytes_accessed = (
        B * F * 4                                           # x read (f32)
        + sum(int(a.size) * a.dtype.itemsize
              for a in (w1p, b1p, w2p, b2p, w3p, b3p))      # resident weights
        + B * out_feature * 4)                              # narrow f32 output

    out = pl.pallas_call(
        mlp_kernel,
        out_shape=jax.ShapeDtypeStruct((B, out_feature), jnp.float32),
        grid=grid,
        in_specs=[
            # x tile streams over the batch grid axis (auto double-buffered).
            # Add pipeline_mode=pl.Buffered(3) only if a profile shows exposed DMA.
            pl.BlockSpec((tm, F), lambda i: (i, 0)),
            const_spec(w1p), const_spec(b1p),
            const_spec(w2p), const_spec(b2p),
            const_spec(w3p), const_spec(b3p),
        ],
        out_specs=pl.BlockSpec((tm, out_feature), lambda i: (i, 0)),
        compiler_params=pltpu.CompilerParams(
            dimension_semantics=("parallel",),   # shard batch across TCs on v7x
            vmem_limit_bytes=32 << 20,
        ),
        cost_estimate=pl.CostEstimate(
            flops=int(flops), transcendentals=0,
            bytes_accessed=int(bytes_accessed)),
    )(x, w1p, b1p, w2p, b2p, w3p, b3p)

    return out


def init_params(key, in_feature, out_feature=3):
    """Deterministic PyTorch-style init: U(-1/sqrt(fan_in), 1/sqrt(fan_in)).
    Weights stored as [in, out]; biases as [1, out]."""
    def linear(k, fan_in, fan_out):
        kw, kb = jax.random.split(k)
        bound = 1.0 / jnp.sqrt(fan_in)
        w = jax.random.uniform(kw, (fan_in, fan_out), jnp.float32, -bound, bound)
        b = jax.random.uniform(kb, (1, fan_out), jnp.float32, -bound, bound)
        return w, b

    k1, k2, k3 = jax.random.split(key, 3)
    w1, b1 = linear(k1, in_feature, HIDDEN)
    w2, b2 = linear(k2, HIDDEN, HIDDEN)
    w3, b3 = linear(k3, HIDDEN, out_feature)
    return (w1, b1, w2, b2, w3, b3)


def reference_forward(x, params):
    w1, b1, w2, b2, w3, b3 = params
    h1 = jnp.maximum(x @ w1 + b1, 0.0)
    h2 = jnp.maximum(h1 @ w2 + b2, 0.0)
    return h2 @ w3 + b3


if __name__ == "__main__":
    B, IN_FEATURE, OUT_FEATURE = 8, 32, 3

    key = jax.random.PRNGKey(0)
    kx, kp = jax.random.split(key)
    x = jax.random.normal(kx, (B, IN_FEATURE), jnp.float32)
    params = init_params(kp, IN_FEATURE, OUT_FEATURE)

    out = custom_classifier_forward(x, params)
    out = jax.block_until_ready(out)

    ref = reference_forward(x, params)
    assert out.shape == (B, OUT_FEATURE)
    # bf16 matmul inputs (f32 accumulate) -> loosened tolerance vs f32 reference.
    assert jnp.allclose(out, ref, atol=3e-2, rtol=3e-2), "mismatch vs reference"

    print("KERNEL_OK")
</pallas_src>

<mosaic_0001>
module attributes {stable_mosaic.version = 11 : i64} {
  func.func @mlp_kernel(%arg0: i32, %arg1: memref<8x32xf32, #tpu.memory_space<vmem>>, %arg2: memref<32x128xbf16, #tpu.memory_space<vmem>>, %arg3: memref<1x128xf32, #tpu.memory_space<vmem>>, %arg4: memref<128x128xbf16, #tpu.memory_space<vmem>>, %arg5: memref<1x128xf32, #tpu.memory_space<vmem>>, %arg6: memref<128x3xbf16, #tpu.memory_space<vmem>>, %arg7: memref<1x3xf32, #tpu.memory_space<vmem>>, %arg8: memref<8x3xf32, #tpu.memory_space<vmem>>) attributes {dimension_semantics = [#tpu.dimension_semantics<parallel>], iteration_bounds = array<i64: 1>, scalar_prefetch = 0 : i64, scratch_operands = 0 : i64, tpu.core_type = #tpu.core_type<tc>, window_params = [{transform_indices = @transform_0, window_bounds = array<i64: 8, 32>}, {pipeline_mode = #tpu.pipeline_mode<synchronous>, transform_indices = @transform_1, window_bounds = array<i64: 32, 128>}, {pipeline_mode = #tpu.pipeline_mode<synchronous>, transform_indices = @transform_2, window_bounds = array<i64: 1, 128>}, {pipeline_mode = #tpu.pipeline_mode<synchronous>, transform_indices = @transform_3, window_bounds = array<i64: 128, 128>}, {pipeline_mode = #tpu.pipeline_mode<synchronous>, transform_indices = @transform_4, window_bounds = array<i64: 1, 128>}, {pipeline_mode = #tpu.pipeline_mode<synchronous>, transform_indices = @transform_5, window_bounds = array<i64: 128, 3>}, {pipeline_mode = #tpu.pipeline_mode<synchronous>, transform_indices = @transform_6, window_bounds = array<i64: 1, 3>}, {transform_indices = @transform_7, window_bounds = array<i64: 8, 3>}]} {
    %c0 = arith.constant 0 : index
    %c0_0 = arith.constant 0 : index
    %0 = vector.load %arg1[%c0, %c0_0] : memref<8x32xf32, #tpu.memory_space<vmem>>, vector<8x32xf32>
    %1 = arith.truncf %0 : vector<8x32xf32> to vector<8x32xbf16>
    %c0_1 = arith.constant 0 : index
    %c0_2 = arith.constant 0 : index
    %2 = vector.load %arg2[%c0_1, %c0_2] : memref<32x128xbf16, #tpu.memory_space<vmem>>, vector<32x128xbf16>
    %cst = arith.constant dense<0.000000e+00> : vector<8x128xf32>
    %3 = tpu.matmul %1, %2, %cst {dimension_numbers = #tpu.dot_dimension_numbers<[1], [0], [0], [1], [0, 0, 1, 1], [], []>} : vector<8x32xbf16>, vector<32x128xbf16>, vector<8x128xf32> -> vector<8x128xf32>
    %c0_3 = arith.constant 0 : index
    %c0_4 = arith.constant 0 : index
    %4 = vector.load %arg3[%c0_3, %c0_4] : memref<1x128xf32, #tpu.memory_space<vmem>>, vector<1x128xf32>
    %5 = vector.broadcast %4 : vector<1x128xf32> to vector<8x128xf32>
    %6 = arith.addf %3, %5 : vector<8x128xf32>
    %cst_5 = arith.constant 0.000000e+00 : f32
    %7 = vector.broadcast %cst_5 : f32 to vector<8x128xf32>
    %8 = arith.maximumf %6, %7 : vector<8x128xf32>
    %9 = arith.truncf %8 : vector<8x128xf32> to vector<8x128xbf16>
    %c0_6 = arith.constant 0 : index
    %c0_7 = arith.constant 0 : index
    %10 = vector.load %arg4[%c0_6, %c0_7] : memref<128x128xbf16, #tpu.memory_space<vmem>>, vector<128x128xbf16>
    %cst_8 = arith.constant dense<0.000000e+00> : vector<8x128xf32>
    %11 = tpu.matmul %9, %10, %cst_8 {dimension_numbers = #tpu.dot_dimension_numbers<[1], [0], [0], [1], [0, 0, 1, 1], [], []>} : vector<8x128xbf16>, vector<128x128xbf16>, vector<8x128xf32> -> vector<8x128xf32>
    %c0_9 = arith.constant 0 : index
    %c0_10 = arith.constant 0 : index
    %12 = vector.load %arg5[%c0_9, %c0_10] : memref<1x128xf32, #tpu.memory_space<vmem>>, vector<1x128xf32>
    %13 = vector.broadcast %12 : vector<1x128xf32> to vector<8x128xf32>
    %14 = arith.addf %11, %13 : vector<8x128xf32>
    %cst_11 = arith.constant 0.000000e+00 : f32
    %15 = vector.broadcast %cst_11 : f32 to vector<8x128xf32>
    %16 = arith.maximumf %14, %15 : vector<8x128xf32>
    %17 = arith.truncf %16 : vector<8x128xf32> to vector<8x128xbf16>
    %c0_12 = arith.constant 0 : index
    %c0_13 = arith.constant 0 : index
    %18 = vector.load %arg6[%c0_12, %c0_13] : memref<128x3xbf16, #tpu.memory_space<vmem>>, vector<128x3xbf16>
    %cst_14 = arith.constant dense<0.000000e+00> : vector<8x3xf32>
    %19 = tpu.matmul %17, %18, %cst_14 {dimension_numbers = #tpu.dot_dimension_numbers<[1], [0], [0], [1], [0, 0, 1, 1], [], []>} : vector<8x128xbf16>, vector<128x3xbf16>, vector<8x3xf32> -> vector<8x3xf32>
    %c0_15 = arith.constant 0 : index
    %c0_16 = arith.constant 0 : index
    %20 = vector.load %arg7[%c0_15, %c0_16] : memref<1x3xf32, #tpu.memory_space<vmem>>, vector<1x3xf32>
    %21 = vector.broadcast %20 : vector<1x3xf32> to vector<8x3xf32>
    %22 = arith.addf %19, %21 : vector<8x3xf32>
    %c0_17 = arith.constant 0 : index
    %c0_18 = arith.constant 0 : index
    %23 = vector.load %arg8[%c0_17, %c0_18] : memref<8x3xf32, #tpu.memory_space<vmem>>, vector<8x3xf32>
    tpu.vector_store %arg8[%c0_17, %c0_18], %22 {strides = array<i32>} : memref<8x3xf32, #tpu.memory_space<vmem>>, vector<8x3xf32>,
    return
  }
  func.func @transform_0(%arg0: i32) -> (i32, i32) {
    %c0_i32 = arith.constant 0 : i32
    %c0_i32_0 = arith.constant 0 : i32
    return %arg0, %c0_i32 : i32, i32
  }
  func.func @transform_1(%arg0: i32) -> (i32, i32) {
    %c0_i32 = arith.constant 0 : i32
    %c0_i32_0 = arith.constant 0 : i32
    %c0_i32_1 = arith.constant 0 : i32
    return %c0_i32, %c0_i32_0 : i32, i32
  }
  func.func @transform_2(%arg0: i32) -> (i32, i32) {
    %c0_i32 = arith.constant 0 : i32
    %c0_i32_0 = arith.constant 0 : i32
    %c0_i32_1 = arith.constant 0 : i32
    return %c0_i32, %c0_i32_0 : i32, i32
  }
  func.func @transform_3(%arg0: i32) -> (i32, i32) {
    %c0_i32 = arith.constant 0 : i32
    %c0_i32_0 = arith.constant 0 : i32
    %c0_i32_1 = arith.constant 0 : i32
    return %c0_i32, %c0_i32_0 : i32, i32
  }
  func.func @transform_4(%arg0: i32) -> (i32, i32) {
    %c0_i32 = arith.constant 0 : i32
    %c0_i32_0 = arith.constant 0 : i32
    %c0_i32_1 = arith.constant 0 : i32
    return %c0_i32, %c0_i32_0 : i32, i32
  }
  func.func @transform_5(%arg0: i32) -> (i32, i32) {
    %c0_i32 = arith.constant 0 : i32
    %c0_i32_0 = arith.constant 0 : i32
    %c0_i32_1 = arith.constant 0 : i32
    return %c0_i32, %c0_i32_0 : i32, i32
  }
  func.func @transform_6(%arg0: i32) -> (i32, i32) {
    %c0_i32 = arith.constant 0 : i32
    %c0_i32_0 = arith.constant 0 : i32
    %c0_i32_1 = arith.constant 0 : i32
    return %c0_i32, %c0_i32_0 : i32, i32
  }
  func.func @transform_7(%arg0: i32) -> (i32, i32) {
    %c0_i32 = arith.constant 0 : i32
    %c0_i32_0 = arith.constant 0 : i32
    return %arg0, %c0_i32 : i32, i32
  }
}

</mosaic_0001>

<bundles_post_ra>
// kernel: tpu_custom_call.1
= control target key start
LH: loop header
LB: loop body
LE: loop exit
PB: predicated region body
PF: predicated region fallthrough
CT: control target
= control target key end

     0   :  { %12 = vsyncpa [#allocation3], 0  ;;  %s651_s0 = inlined_call_operand.hbm [shape: f32[8,32], index: 0, kind: input, shape index: {}]   ;;  %s652_s1 = inlined_call_operand.hbm [shape: bf16[32,128], index: 1, kind: input, shape index: {}]   ;;  %s653_s2 = inlined_call_operand.vmem [shape: f32[1,128], index: 2, kind: input, shape index: {}]   ;;  %s654_s3 = inlined_call_operand.vmem [shape: bf16[128,128], index: 3, kind: input, shape index: {}]   ;;  %s655_s4 = inlined_call_operand.vmem [shape: f32[1,128], index: 4, kind: input, shape index: {}]   ;;  %s656_s5 = inlined_call_operand.vmem [shape: bf16[128,3], index: 5, kind: input, shape index: {}]   ;;  %s657_s6 = inlined_call_operand.vmem [shape: f32[1,3], index: 6, kind: input, shape index: {}]   ;;  %s658_s7 = inlined_call_operand.vmem [shape: f32[8,3], index: 7, kind: output, shape index: {}]  }
   0x1   :  { %13 = vsyncpa [#allocation5], 0  ;;  %s515_s24 = smov [#allocation2]   ;;  %s516_s26 = smov [#allocation4]  }
   0x2   :  { %s20_s25 = sshll.u32 %s515_s24, 4  ;;  %s29_s27 = sshll.u32 %s516_s26, 4  ;;  %s21_s25 = int_to_ptr.vmem [resolvable:$true] %s20_s25  ;;  %s30_s27 = int_to_ptr.vmem [resolvable:$true] %s29_s27 }
   0x3   :  { %s479_s28 = scalar_lea.vmem %s21_s25, 128  ;;  %p484_p1 = scmp.lt.s32.totalorder %s21_s25, %s21_s25 }
   0x4   :  { %p480_p0 = scmp.ne.s32.totalorder %s21_s25, %s479_s28  ;;  %p485_p2 = scmp.lt.s32.totalorder %s479_s28, %s479_s28 }
   0x6   :  { %p486_p3 = por %p485_p2, %p484_p1 }
   0x8   :  { %p487_p4 = pnand %p486_p3, %p480_p0 }
   0xa   :  { %490 = shalt.err (!%p487_p4)
}
   0xb   :  { %23 = dma.hbm_to_vmem [thread:$0]  %s651_s0, 128, %s21_s25, [#allocation3]  }
   0xc   :  { %s499_s8 = scalar_lea.vmem %s30_s27, 256  ;;  %p504_p6 = scmp.lt.s32.totalorder %s30_s27, %s30_s27 }
   0xd   :  { %p500_p5 = scmp.ne.s32.totalorder %s30_s27, %s499_s8  ;;  %p505_p7 = scmp.lt.s32.totalorder %s499_s8, %s499_s8 }
   0xf   :  { %p506_p8 = por %p505_p7, %p504_p6 }
  0x11   :  { %p507_p9 = pnand %p506_p8, %p500_p5 }
  0x13   :  { %510 = shalt.err (!%p507_p9)
}
  0x14   :  { %s517_s9 = smov 64   ;;  %s518_s10 = smov 4  }
  0x15   :  { %35 = dma.hbm_to_vmem [thread:$0]  %s652_s1, 256, %s30_s27, [#allocation5], %s517_s9, %s517_s9, %s518_s10  }
  0x16   :  { %511 = dma.done.wait [#allocation3], 128  }
  0x17   :  { %512 = vsyncadd [#allocation3], 4294967168 }
  0x18   :  { %513 = dma.done.wait [#allocation5], 256  }
  0x19   :  { %514 = vsyncadd [#allocation5], 4294967040  ;;  %v519_v0 = vmov 0.0   ;;  %vm520_vm0 = vmmov 0   ;;  %v453_v1 = vld [vmem:[#allocation4 + $0x8] sm:$0xff]   ;;  %v454_v2 = vld [vmem:[#allocation4] sm:$0xff]  }
  0x1a   :  { %399 = vmatprep.subr.bf16.mxu0 %v519_v0  ;;  %403 = vmatprep.mubr.msk.bf16.mxu0 %vm520_vm0, %v519_v0  ;;  %v53_v3 = vld [vmem:[#allocation2] sm:$0xff]  ;;  %v455_v4 = vld [vmem:[%s654_s3 + $0x38] sm:$0xff]   ;;  %v456_v6 = vld [vmem:[%s654_s3 + $0x30] sm:$0xff]   ;;  %vm78_vm1 = vcmask 261120   ;;  %vm348_vm2 = vcmask 23552  }
  0x1b   :  { %407 = vmatprep.subr.bf16.mxu1 %v519_v0  ;;  %423 = vmatprep.mubr.msk.bf16.mxu1 %vm520_vm0, %v519_v0  ;;  %v54_v5 = vpack.c.bf16 %v53_v3, %v53_v3  ;;  %v457_v7 = vld [vmem:[%s654_s3 + $0x28] sm:$0xff]   ;;  %v458_v8 = vld [vmem:[%s654_s3 + $0x20] sm:$0xff]   ;;  %v459_v9 = vld [vmem:[%s654_s3 + $0x18] sm:$0xff]  }
  0x1c   :  { %400 = vmatpush3.bf16.msra.mxu0 %v453_v1  ;;  %408 = vmatpush3.bf16.msra.mxu1 %v455_v4  ;;  %v460_v10 = vld [vmem:[%s654_s3 + $0x10] sm:$0xff]   ;;  %v461_v11 = vld [vmem:[%s654_s3 + $0x8] sm:$0xff]   ;;  %v462_v12 = vld [vmem:[%s654_s3] sm:$0xff]  }
  0x1d   :  { %401 = vmatprep.subr.bf16.mxu0 %v519_v0  ;;  %409 = vmatprep.subr.bf16.mxu1 %v519_v0  ;;  %v463_v13 = vld [vmem:[%s656_s5 + $0x38] sm:$0xff]   ;;  %v464_v14 = vld [vmem:[%s656_s5 + $0x30] sm:$0xff]   ;;  %v465_v15 = vld [vmem:[%s656_s5 + $0x28] sm:$0xff]  }
  0x1e   :  { %v466_v16 = vld [vmem:[%s656_s5 + $0x20] sm:$0xff]   ;;  %v467_v17 = vld [vmem:[%s656_s5 + $0x18] sm:$0xff]   ;;  %v468_v18 = vld [vmem:[%s656_s5 + $0x10] sm:$0xff]  }
  0x1f   :  { %v356_v19 = vld [vmem:[%s653_s2] ss:$0 sm:$0xff]  ;;  %v469_v27 = vld [vmem:[%s656_s5 + $0x8] sm:$0xff]  }
  0x20   :  { %402 = vmatpush3.bf16.msra.mxu0 %v454_v2  ;;  %410 = vmatpush3.bf16.msra.mxu1 %v456_v6  ;;  %v470_v28 = vld [vmem:[%s656_s5] sm:$0xff]  }
  0x21   :  { %427 = vmatprep.subr.bf16.mxu0 %v519_v0  ;;  %411 = vmatprep.subr.bf16.mxu1 %v519_v0  ;;  %v360_v29 = vld [vmem:[%s655_s4] ss:$0 sm:$0xff] }
  0x22   :  { %v369_v37 = vld [vmem:[%s657_s6] ss:$0 sm:$0xff] }
  0x23   :  { %404 = vmatmul.mubr.msk.bf16.vlgmr.msra.gmra.mxu0 %vm78_vm1, %v54_v5 }
  0x24   :  { %443 = vmatprep.mubr.msk.bf16.mxu0 %vm520_vm0, %v519_v0  ;;  %412 = vmatpush3.bf16.msra.mxu1 %v457_v7 }
  0x25   :  { %413 = vmatprep.subr.bf16.mxu1 %v519_v0  ;;  %428 = vmatpush3.bf16.msra.mxu0 %v463_v13 }
  0x26   :  { %429 = vmatprep.subr.bf16.mxu0 %v519_v0 }
  0x28   :  { %414 = vmatpush3.bf16.msra.mxu1 %v458_v8 }
  0x29   :  { %415 = vmatprep.subr.bf16.mxu1 %v519_v0  ;;  %430 = vmatpush3.bf16.msra.mxu0 %v464_v14 }
  0x2a   :  { %431 = vmatprep.subr.bf16.mxu0 %v519_v0 }
  0x2c   :  { %416 = vmatpush3.bf16.msra.mxu1 %v459_v9 }
  0x2d   :  { %417 = vmatprep.subr.bf16.mxu1 %v519_v0  ;;  %432 = vmatpush3.bf16.msra.mxu0 %v465_v15 }
  0x2e   :  { %433 = vmatprep.subr.bf16.mxu0 %v519_v0 }
  0x30   :  { %418 = vmatpush3.bf16.msra.mxu1 %v460_v10 }
  0x31   :  { %419 = vmatprep.subr.bf16.mxu1 %v519_v0  ;;  %434 = vmatpush3.bf16.msra.mxu0 %v466_v16 }
  0x32   :  { %435 = vmatprep.subr.bf16.mxu0 %v519_v0 }
  0x34   :  { %420 = vmatpush3.bf16.msra.mxu1 %v461_v11 }
  0x35   :  { %421 = vmatprep.subr.bf16.mxu1 %v519_v0  ;;  %436 = vmatpush3.bf16.msra.mxu0 %v467_v17 }
  0x36   :  { %437 = vmatprep.subr.bf16.mxu0 %v519_v0 }
  0x38   :  { %422 = vmatpush3.bf16.msra.mxu1 %v462_v12 }
  0x39   :  { %438 = vmatpush3.bf16.msra.mxu0 %v468_v18 }
  0x3a   :  { %439 = vmatprep.subr.bf16.mxu0 %v519_v0 }
  0x3d   :  { %440 = vmatpush3.bf16.msra.mxu0 %v469_v27 }
  0x3e   :  { %441 = vmatprep.subr.bf16.mxu0 %v519_v0 }
  0x41   :  { %442 = vmatpush3.bf16.msra.mxu0 %v470_v28 }
  0xe3   :  { %v116_v20 = vpop.f32.mrf.mxu0 }
  0xe4   :  { %v117_v21 = vadd.f32 %v356_v19, %v116_v20 }
  0xe5   :  { %v405_v22 = vpop.f32.mrf.mxu0 }
  0xe6   :  { %v122_v23 = vmax.f32 %v117_v21, 0.0 }
  0xe7   :  { %v119_v24 = vpop.f32.mrf.mxu0 }
  0xe8   :  { %v123_v25 = vpack.c.bf16 %v122_v23, %v122_v23 }
  0xe9   :  { %v406_v26 = vpop.f32.mrf.mxu0 }
  0xea   :  { %424 = vmatmul.mubr.bf16.vlgmr.msra.gmra.mxu1 %v123_v25 }
 0x1aa   :  { %v229_v30 = vpop.f32.mrf.mxu1 }
 0x1ab   :  { %v230_v31 = vadd.f32 %v360_v29, %v229_v30 }
 0x1ac   :  { %v425_v32 = vpop.f32.mrf.mxu1 }
 0x1ad   :  { %v235_v33 = vmax.f32 %v230_v31, 0.0 }
 0x1ae   :  { %v232_v34 = vpop.f32.mrf.mxu1 }
 0x1af   :  { %v236_v35 = vpack.c.bf16 %v235_v33, %v235_v33 }
 0x1b0   :  { %v426_v36 = vpop.f32.mrf.mxu1 }
 0x1b1   :  { %444 = vmatmul.mubr.bf16.vlgmr.msra.gmra.mxu0 %v236_v35 }
 0x271   :  { %v342_v38 = vpop.f32.mrf.mxu0 }
 0x272   :  { %v343_v39 = vadd.f32 %v369_v37, %v342_v38 }
 0x273   :  { %v445_v40 = vpop.f32.mrf.mxu0 }
 0x274   :  { %349 = vst.msk [vmem:[%s658_s7] sm:$0xff] %vm348_vm2, %v343_v39 }
 0x275   :  { %v345_v41 = vpop.f32.mrf.mxu0 }
 0x277   :  { %v446_v42 = vpop.f32.mrf.mxu0 }
 0x278   :  { %354 = vsyncpa [#allocation3], 1 }
 0x279   :  { %355 = vsyncpa [#allocation5], 1 }

</bundles_post_ra>
